<compile_context>
chip_gen: v7x
topology: tpu7x:2x2x1
jax: 0.10.0
libtpu: 0.0.40
codegen_flags: <defaults>
</compile_context>

<pallas_src>
import jax
import jax.numpy as jnp
from jax.experimental import pallas as pl
from jax.experimental.pallas import tpu as pltpu

C_IN = 64
C_MID = 32
C_OUT = 64


def _round_up(a, m):
    return ((a + m - 1) // m) * m


def _reweight_kernel(x_ref, alpha_ref, wT_ref, b_ref, o_ref):
    # x_ref: (BB, 64, TS) tile -- batch block x channels x spatial (lane dim).
    alpha = alpha_ref[0]          # PReLU shared parameter from SMEM
    w = wT_ref[...]               # (C_OUT, C_IN) fused weight (transposed)
    bias = b_ref[...]             # (C_OUT, 1), broadcasts over spatial lanes

    bb = x_ref.shape[0]           # static batch-block size -> unrolled loop
    for b in range(bb):
        x = x_ref[b]                                   # (C_IN, TS)
        # PReLU (num_parameters=1). Dropout(p=0.0) is the identity.
        x = jnp.where(x > 0, x, alpha * x)
        # Fused 1x1 convs: one (64,64) x (64,TS) MXU matmul + bias.
        y = jnp.dot(w, x, preferred_element_type=jnp.float32) + bias
        o_ref[b] = y.astype(o_ref.dtype)


def reweight_forward(x_nchw, alpha, w1, b1, w2, b2, *,
                     tile_s=8192, target_step_bytes=2 * 1024 * 1024):
    """x_nchw: [N, 64, H, W].  Returns [N, 64, H, W].

    w1: (Cin=64, Cmid=32), b1: (32,), w2: (Cmid=32, Cout=64), b2: (64,).
    """
    n, c, h, w = x_nchw.shape
    assert c == C_IN
    hw = h * w

    # --- Fuse conv1 + conv2 (exact: no nonlinearity in between) -------------
    w_fused = jnp.dot(w1.astype(jnp.float32), w2.astype(jnp.float32))       # (Cin, Cout)
    b_fused = jnp.dot(b1.astype(jnp.float32), w2.astype(jnp.float32)) \
        + b2.astype(jnp.float32)                                            # (Cout,)
    wT = w_fused.T                                   # (Cout, Cin) = (64, 64)
    b_col = b_fused.reshape(C_OUT, 1)
    alpha1d = jnp.asarray(alpha, jnp.float32).reshape(1)

    # --- Stay in NCHW: spatial flattened to the lane-dense last dim ---------
    x_flat = x_nchw.reshape(n, c, hw)                # free reshape

    # Spatial tile: a multiple of 128 (or the full extent), with ragged tail
    # bounded to <128 wasted lanes per tile.  No wrapper-side padding.
    if hw <= tile_s:
        ts = hw                                      # full extent (always legal)
        n_s = 1
    else:
        n_s = pl.cdiv(hw, tile_s)
        ts = _round_up(pl.cdiv(hw, n_s), 128)
        n_s = pl.cdiv(hw, ts)

    # Batch block: each grid step should move >= ~2 MiB of input.
    bytes_per_b = C_IN * ts * x_flat.dtype.itemsize
    bb = max(1, min(n, target_step_bytes // max(1, bytes_per_b)))
    bb = min(bb, 16)                                 # bound static unroll
    # Keep at least 2 grid steps when possible (feed both v7x TensorCores).
    if n_s * pl.cdiv(n, bb) < 2 and n > 1:
        bb = pl.cdiv(n, 2)
    n_b = pl.cdiv(n, bb)

    out_flat = pl.pallas_call(
        _reweight_kernel,
        out_shape=jax.ShapeDtypeStruct((n, C_OUT, hw), x_nchw.dtype),
        grid=(n_b, n_s),
        in_specs=[
            pl.BlockSpec((bb, C_IN, ts), lambda bi, si: (bi, 0, si)),   # x tile
            pl.BlockSpec(memory_space=pltpu.MemorySpace.SMEM),          # prelu alpha
            pl.BlockSpec((C_OUT, C_IN), lambda bi, si: (0, 0)),         # fused W^T
            pl.BlockSpec((C_OUT, 1), lambda bi, si: (0, 0)),            # fused bias
        ],
        out_specs=pl.BlockSpec((bb, C_OUT, ts), lambda bi, si: (bi, 0, si)),
        compiler_params=pltpu.CompilerParams(
            dimension_semantics=("parallel", "parallel"),
            vmem_limit_bytes=32 * 1024 * 1024,   # covers ts=8192 on v5e's 16 MiB default
        ),
    )(x_flat, alpha1d, wT, b_col)

    return out_flat.reshape(n, C_OUT, h, w)


def _reference(x_nchw, alpha, w1, b1, w2, b2):
    """Pure-JAX reference matching PyTorch semantics (unfused, for validation)."""
    x = jnp.where(x_nchw > 0, x_nchw, jnp.asarray(alpha).reshape(()) * x_nchw)
    hmid = jnp.einsum("nchw,co->nohw", x, w1) + b1.reshape(1, C_MID, 1, 1)
    y = jnp.einsum("nchw,co->nohw", hmid, w2) + b2.reshape(1, C_OUT, 1, 1)
    return y


if __name__ == "__main__":
    key = jax.random.PRNGKey(0)
    k_x, k_w1, k_b1, k_w2, k_b2 = jax.random.split(key, 5)

    # Small example: batch=2, channels=64 (required by the module), 16x16 spatial.
    x = jax.random.normal(k_x, (2, C_IN, 16, 16), dtype=jnp.float32)

    # Deterministic parameters (PReLU default alpha = 0.25; convs ~ N(0, 0.05)).
    alpha = jnp.array([0.25], dtype=jnp.float32)
    w1 = jax.random.normal(k_w1, (C_IN, C_MID), dtype=jnp.float32) * 0.05
    b1 = jax.random.normal(k_b1, (C_MID,), dtype=jnp.float32) * 0.05
    w2 = jax.random.normal(k_w2, (C_MID, C_OUT), dtype=jnp.float32) * 0.05
    b2 = jax.random.normal(k_b2, (C_OUT,), dtype=jnp.float32) * 0.05

    out = jax.block_until_ready(reweight_forward(x, alpha, w1, b1, w2, b2))
    ref = _reference(x, alpha, w1, b1, w2, b2)

    assert out.shape == (2, C_OUT, 16, 16)
    assert jnp.allclose(out, ref, atol=1e-4, rtol=1e-4), "mismatch vs reference"

    print("KERNEL_OK")
</pallas_src>

<mosaic_0001>
module attributes {stable_mosaic.version = 11 : i64} {
  func.func @_reweight_kernel(%arg0: i32, %arg1: i32, %arg2: memref<1x64x256xf32, #tpu.memory_space<vmem>>, %arg3: memref<1xf32, #tpu.memory_space<smem>>, %arg4: memref<64x64xf32, #tpu.memory_space<vmem>>, %arg5: memref<64x1xf32, #tpu.memory_space<vmem>>, %arg6: memref<1x64x256xf32, #tpu.memory_space<vmem>>) attributes {dimension_semantics = [#tpu.dimension_semantics<parallel>, #tpu.dimension_semantics<parallel>], iteration_bounds = array<i64: 2, 1>, scalar_prefetch = 0 : i64, scratch_operands = 0 : i64, tpu.core_type = #tpu.core_type<tc>, window_params = [{transform_indices = @transform_0, window_bounds = array<i64: 1, 64, 256>}, {transform_indices = @transform_1, window_bounds = array<i64: 1>}, {pipeline_mode = #tpu.pipeline_mode<synchronous>, transform_indices = @transform_2, window_bounds = array<i64: 64, 64>}, {pipeline_mode = #tpu.pipeline_mode<synchronous>, transform_indices = @transform_3, window_bounds = array<i64: 64, 1>}, {transform_indices = @transform_4, window_bounds = array<i64: 1, 64, 256>}]} {
    %c0 = arith.constant 0 : index
    %0 = memref.load %arg3[%c0] : memref<1xf32, #tpu.memory_space<smem>>
    %c0_0 = arith.constant 0 : index
    %c0_1 = arith.constant 0 : index
    %1 = vector.load %arg4[%c0_0, %c0_1] : memref<64x64xf32, #tpu.memory_space<vmem>>, vector<64x64xf32>
    %c0_2 = arith.constant 0 : index
    %c0_3 = arith.constant 0 : index
    %2 = vector.load %arg5[%c0_2, %c0_3] : memref<64x1xf32, #tpu.memory_space<vmem>>, vector<64x1xf32>
    %c0_4 = arith.constant 0 : index
    %c0_5 = arith.constant 0 : index
    %c0_6 = arith.constant 0 : index
    %3 = vector.load %arg2[%c0_4, %c0_5, %c0_6] : memref<1x64x256xf32, #tpu.memory_space<vmem>>, vector<1x64x256xf32>
    %4 = vector.shape_cast %3 : vector<1x64x256xf32> to vector<64x256xf32>
    %cst = arith.constant 0.000000e+00 : f32
    %5 = vector.broadcast %cst : f32 to vector<64x256xf32>
    %6 = arith.cmpf ogt, %4, %5 : vector<64x256xf32>
    %7 = vector.broadcast %0 : f32 to vector<64x256xf32>
    %8 = arith.mulf %7, %4 : vector<64x256xf32>
    %9 = arith.select %6, %4, %8 : vector<64x256xi1>, vector<64x256xf32>
    %cst_7 = arith.constant dense<0.000000e+00> : vector<64x256xf32>
    %10 = tpu.matmul %1, %9, %cst_7 {dimension_numbers = #tpu.dot_dimension_numbers<[1], [0], [0], [1], [0, 0, 1, 1], [], []>} : vector<64x64xf32>, vector<64x256xf32>, vector<64x256xf32> -> vector<64x256xf32>
    %11 = vector.broadcast %2 : vector<64x1xf32> to vector<64x256xf32>
    %12 = arith.addf %10, %11 : vector<64x256xf32>
    %c0_8 = arith.constant 0 : index
    %c0_9 = arith.constant 0 : index
    %c0_10 = arith.constant 0 : index
    %13 = vector.load %arg6[%c0_8, %c0_9, %c0_10] : memref<1x64x256xf32, #tpu.memory_space<vmem>>, vector<1x64x256xf32>
    %14 = vector.shape_cast %13 : vector<1x64x256xf32> to vector<64x256xf32>
    %15 = vector.shape_cast %12 : vector<64x256xf32> to vector<1x64x256xf32>
    tpu.vector_store %arg6[%c0_8, %c0_9, %c0_10], %15 {strides = array<i32>} : memref<1x64x256xf32, #tpu.memory_space<vmem>>, vector<1x64x256xf32>,
    return
  }
  func.func @transform_0(%arg0: i32, %arg1: i32) -> (i32, i32, i32) {
    %c0_i32 = arith.constant 0 : i32
    %c0_i32_0 = arith.constant 0 : i32
    return %arg0, %c0_i32, %arg1 : i32, i32, i32
  }
  func.func @transform_1(%arg0: i32, %arg1: i32) -> i32 {
    %c0_i32 = arith.constant 0 : i32
    %c0_i32_0 = arith.constant 0 : i32
    return %c0_i32 : i32
  }
  func.func @transform_2(%arg0: i32, %arg1: i32) -> (i32, i32) {
    %c0_i32 = arith.constant 0 : i32
    %c0_i32_0 = arith.constant 0 : i32
    %c0_i32_1 = arith.constant 0 : i32
    return %c0_i32, %c0_i32_0 : i32, i32
  }
  func.func @transform_3(%arg0: i32, %arg1: i32) -> (i32, i32) {
    %c0_i32 = arith.constant 0 : i32
    %c0_i32_0 = arith.constant 0 : i32
    %c0_i32_1 = arith.constant 0 : i32
    return %c0_i32, %c0_i32_0 : i32, i32
  }
  func.func @transform_4(%arg0: i32, %arg1: i32) -> (i32, i32, i32) {
    %c0_i32 = arith.constant 0 : i32
    %c0_i32_0 = arith.constant 0 : i32
    return %arg0, %c0_i32, %arg1 : i32, i32, i32
  }
}

</mosaic_0001>

<bundles_post_ra>
// kernel: tpu_custom_call.1
= control target key start
LH: loop header
LB: loop body
LE: loop exit
PB: predicated region body
PF: predicated region fallthrough
CT: control target
= control target key end

     0   :  { %s1190_s0 = inlined_call_operand.hbm [shape: f32[2,64,256], index: 0, kind: input, shape index: {}]   ;;  %s1191_s1 = inlined_call_operand.<no memory space> [shape: f32[1], index: 1, kind: input, shape index: {}]   ;;  %s1192_s2 = inlined_call_operand.vmem [shape: f32[64,64], index: 2, kind: input, shape index: {}]   ;;  %s1193_s3 = inlined_call_operand.vmem [shape: f32[64,1], index: 3, kind: input, shape index: {}]   ;;  %s1194_s4 = inlined_call_operand.hbm [shape: f32[2,64,256], index: 4, kind: output, shape index: {}]  }
   0x1   :  { %9 = sst [smem:[#allocation2]] %s1191_s1 }
   0x2   :  { %10 = vsyncpa [#allocation4], 0 }
   0x3   :  { %12 = vsyncpa [#allocation4 + $0x1], 0 }
   0x4   :  { %13 = vsyncpa [#allocation5], 0 }
   0x5   :  { %15 = vsyncpa [#allocation5 + $0x1], 0  ;;  %s885_s17 = smov 0   ;;  %s887_s18 = smov 0  }
   0x6   :  { %s889_s19 = smov 0   ;;  %s891_s20 = smov 0  }
   0x7   :  { %s893_s21 = smov 0   ;;  %s895_s22 = smov 0  }
   0x8 LB: > { %s616_s1 = sadd.s32 4294967295, %s847_s22   ;;  %s617_s23 = sadd.s32 4294967294, %s847_s22   ;;  %s847_s22 = sphi %s895_s22, %s21_s22   ;;  %s843_s21 = sphi %s893_s21, %s1209_s21   ;;  %s839_s20 = sphi %s891_s20, %s1208_s20   ;;  %s835_s19 = sphi %s889_s19, %s1207_s19   ;;  %s831_s18 = sphi %s887_s18, %s1206_s18   ;;  %s827_s17 = sphi %s885_s17, %s1205_s17  }
   0x9   : > { %s33_s24 = sadd.s32 1, %s843_s21  ;;  %s42_s25 = sadd.s32 1, %s835_s19 }
   0xa   : > { %p35_p0 = scmp.ge.s32.totalorder %s33_s24, 2  ;;  %p49_p1 = scmp.ne.s32.totalorder %s835_s19, %s831_s18 }
   0xb   : > { %p50_p2 = scmp.eq.s32.totalorder %s847_s22, 0  ;;  %p55_p3 = scmp.ne.s32.totalorder %s831_s18, %s827_s17 }
   0xc   : > { %s1211_s24 = smov (%p35_p0, %s33_s24), 0  ;;  %p56_p5 = scmp.eq.s32.totalorder %s616_s1, 0 }
   0xd   : > { %p926_p4 = por %p50_p2, %p49_p1  ;;  %s37_s27 = ssub.s32 %s843_s21, %s1211_s24 }
   0xe   : > { %p144_p6 = scmp.eq.s32.totalorder %s616_s1, 1  ;;  %p40_p7 = scmp.eq.s32.totalorder %s37_s27, 0 }
   0xf   : > { %p932_p8 = por %p56_p5, %p55_p3  ;;  %p150_p10 = scmp.eq.s32.totalorder %s617_s23, 1 }
  0x10   : > { %p936_p9 = por %p144_p6, %p49_p1  ;;  %p677_p13 = scmp.lt.s32.totalorder %s847_s22, 2 }
  0x11   : > { %s941_s30 = scalar_select %p40_p7, %s835_s19, %s42_s25  }
  0x12   : > { %s1198_s29 = scalar_select %p936_p9, 1, 0 }
  0x13   : > { %p943_p11 = por %p150_p10, %p55_p3  ;;  %s179_s6 = sand.u32 1, %s835_s19  }
  0x14   : > { %s620_s7 = sshll.u32 %s179_s6, 7  ;;  %s639_s8 = sshll.u32 %s843_s21, 11 }
  0x15   : > { %s1199_s5 = scalar_select %p943_p11, 1, 0 }
  0x16   : > { %s954_s11 = scalar_lea.hbm %s1190_s0, %s639_s8  ;;  %s183_s12 = scalar_lea.vmem [#allocation3], %s620_s7 }
  0x17   : > { %s192_s13 = sshll.u32 %s183_s12, 4  ;;  %p960_p0 = pnand %p677_p13, %p926_p4  ;;  %s956_s13 = int_to_ptr.vmem [resolvable:$true] %s192_s13 }
  0x18   : > { %s965_s15 = scalar_lea.sflag [#allocation4], %s179_s6  ;;  %s735_s16 = scalar_lea.hbm %s954_s11, 2048 }
  0x19   : > { %p736_p2 = scmp.ne.s32.totalorder %s954_s11, %s735_s16  ;;  %p737_p3 = pneg %p960_p0 }
  0x1a   : > { %s740_s25 = scalar_lea.hbm %s1190_s0, 4096  ;;  %p741_p4 = scmp.lt.u32.totalorder %s954_s11, %s1190_s0 }
  0x1b   : > { %p738_p5 = pnand %p737_p3, %p736_p2  ;;  %p742_p7 = scmp.lt.u32.totalorder %s740_s25, %s735_s16 }
  0x1c   : > { %p744_p13 = scmp.lt.u32.totalorder %s735_s16, %s954_s11 }
  0x1d   : > { %p739_p6 = pneg %p738_p5  ;;  %p743_p10 = por %p742_p7, %p741_p4 }
  0x1f   : > { %p745_p12 = por %p744_p13, %p743_p10 }
  0x21   : > { %p746_p1 = pnand %p745_p12, %p739_p6 }
  0x23   : > { %749 = shalt.err (!%p746_p1)
}
  0x24   : > { %s750_s6 = scalar_lea.vmem %s956_s13, 2048  ;;  %s849_s7 = smov [#allocation3]  }
  0x25   : > { %p751_p2 = scmp.ne.s32.totalorder %s956_s13, %s750_s6  ;;  %s755_s8 = sshll.u32 %s849_s7, 4  ;;  %s756_s8 = int_to_ptr.vmem [resolvable:$false] %s755_s8 }
  0x26   : > { %s757_s9 = scalar_lea.vmem %s756_s8, 4096  ;;  %p758_p9 = scmp.lt.s32.totalorder %s956_s13, %s756_s8 }
  0x27   : > { %p753_p5 = pnand %p751_p2, %p737_p3  ;;  %p759_p4 = scmp.lt.s32.totalorder %s757_s9, %s750_s6 }
  0x29   : > { %p754_p11 = pneg %p753_p5  ;;  %p760_p7 = por %p759_p4, %p758_p9 }
  0x2b   : > { %p761_p10 = pnand %p760_p7, %p754_p11 }
  0x2d   : > { %764 = shalt.err (!%p761_p10)
}
  0x2e   : > { %s850_s10 = smov 256   ;;  %s851_s12 = smov 16  }
  0x2f   : > { %672 = dma.hbm_to_vmem [thread:$0]  (!%p960_p0), %s954_s11, 2048, %s956_s13, %s965_s15, %s850_s10, %s850_s10, %s851_s12  }
  0x30   : > { %p200_p12 = scmp.lt.s32.totalorder %s847_s22, 3  ;;  %p1201_p1 = scmp.ge.s32.totalorder %s847_s22, 1 }
  0x32   : > { %p201_p3 = pnand %p1201_p1, %p200_p12 }
  0x33   : > { %s997_s16 = sand.u32 (!%p201_p3), 1, %s831_s18  }
  0x34   : > { %204 = sbr.rel (%p201_p3) target bundleno = 330 (0x14a), region = 36  ;;  %s624_s1 = sshll.u32 (!%p201_p3), %s997_s16, 7 }
  0x35   : > { %s207_s23 = scalar_lea.sflag (!%p201_p3), [#allocation4], %s997_s16  ;;  %s1003_s25 = scalar_lea.vmem (!%p201_p3), [#allocation3], %s624_s1 }
  0x3b   : > { %818 = dma.done.wait (%p932_p8), %s207_s23, 2048  }
  0x3c   : > { %820 = vsyncadd (%p932_p8), %s207_s23, 4294965248  ;;  %s237_s11 = sld [smem:[#allocation2]]  ;;  %v852_v0 = vmov 0.0   ;;  %v853_v1 = vmov 0   ;;  %v255_v2 = vld [vmem:[%s1003_s25 + $0x8] sm:$0xff]  ;;  %v257_v3 = vld [vmem:[%s1003_s25 + $0x18] sm:$0xff] }
  0x3d   : > { %448 = vmatprep.mubr.f32.mxu0 %v852_v0  ;;  %472 = vmatprep.mubr.f32.mxu1 %v852_v0  ;;  %v254_v5 = vld [vmem:[%s1003_s25] sm:$0xff]  ;;  %vm271_vm0 = vcmp.gt.f32.partialorder %v255_v2, 0.0  ;;  %vm273_vm1 = vcmp.gt.f32.partialorder %v257_v3, 0.0  ;;  %v256_v8 = vld [vmem:[%s1003_s25 + $0x10] sm:$0xff]  ;;  %v259_v9 = vld [vmem:[%s1003_s25 + $0x28] sm:$0xff]  ;;  %s1116_s14 = scalar_lea.vmem [#allocation6], %s624_s1 }
  0x3e   : > { %734 = vset.pattern.permute.xlu1 %v853_v1  ;;  %733 = vset.pattern.permute.xlu0 %v853_v1  ;;  %v261_v10 = vld [vmem:[%s1003_s25 + $0x38] sm:$0xff]  ;;  %vm270_vm2 = vcmp.gt.f32.partialorder %v254_v5, 0.0  ;;  %vm272_vm3 = vcmp.gt.f32.partialorder %v256_v8, 0.0  ;;  %v258_v13 = vld [vmem:[%s1003_s25 + $0x20] sm:$0xff]  ;;  %v260_v14 = vld [vmem:[%s1003_s25 + $0x30] sm:$0xff]  ;;  %vm275_vm4 = vcmp.gt.f32.partialorder %v259_v9, 0.0 }
  0x3f   : > { %vm277_vm5 = vcmp.gt.f32.partialorder %v261_v10, 0.0  ;;  %v263_v17 = vld [vmem:[%s1003_s25 + $0x48] sm:$0xff]  ;;  %v265_v22 = vld [vmem:[%s1003_s25 + $0x58] sm:$0xff]  ;;  %vm274_vm6 = vcmp.gt.f32.partialorder %v258_v13, 0.0  ;;  %vm276_vm7 = vcmp.gt.f32.partialorder %v260_v14, 0.0  ;;  %v262_v25 = vld [vmem:[%s1003_s25 + $0x40] sm:$0xff] }
  0x40   : > { %vm279_vm8 = vcmp.gt.f32.partialorder %v263_v17, 0.0  ;;  %v264_v29 = vld [vmem:[%s1003_s25 + $0x50] sm:$0xff]  ;;  %vm281_vm9 = vcmp.gt.f32.partialorder %v265_v22, 0.0  ;;  %v267_v33 = vld [vmem:[%s1003_s25 + $0x68] sm:$0xff]  ;;  %v269_v34 = vld [vmem:[%s1003_s25 + $0x78] sm:$0xff]  ;;  %vm278_vm10 = vcmp.gt.f32.partialorder %v262_v25, 0.0 }
  0x41   : > { %v266_v38 = vld [vmem:[%s1003_s25 + $0x60] sm:$0xff]  ;;  %v248_v39 = vld [vmem:[%s1193_s3 + $0x10] sm:$0xff]  ;;  %vm280_vm11 = vcmp.gt.f32.partialorder %v264_v29, 0.0  ;;  %vm283_vm12 = vcmp.gt.f32.partialorder %v267_v33, 0.0  ;;  %v249_v48 = vld [vmem:[%s1193_s3 + $0x18] sm:$0xff]  ;;  %vm285_vm13 = vcmp.gt.f32.partialorder %v269_v34, 0.0 }
  0x42   : > { %v1013_v4 = vstv %s237_s11  ;;  %v246_v40 = vld [vmem:[%s1193_s3] sm:$0xff]  ;;  %v268_v44 = vld [vmem:[%s1003_s25 + $0x70] sm:$0xff]  ;;  %331 = vperm.xlu1 %734, %v248_v39   ;;  %vm282_vm14 = vcmp.gt.f32.partialorder %v266_v38, 0.0  ;;  %v247_v51 = vld [vmem:[%s1193_s3 + $0x8] sm:$0xff]  ;;  %s640_s1 = sshll.u32 %s839_s20, 11  ;;  %s529_s15 = sshll.u32 %s1116_s14, 4  ;;  %s1137_s15 = int_to_ptr.vmem [resolvable:$true] %s529_s15 }
  0x43   : > { %v288_v6 = vmul.f32 %v1013_v4, %v255_v2  ;;  %v290_v7 = vmul.f32 %v1013_v4, %v257_v3  ;;  %v287_v11 = vmul.f32 %v1013_v4, %v254_v5  ;;  %v289_v12 = vmul.f32 %v1013_v4, %v256_v8  ;;  %321 = vperm.xlu0 %733, %v246_v40   ;;  %v251_v61 = vld [vmem:[%s1193_s3 + $0x28] sm:$0xff]  ;;  %v250_v63 = vld [vmem:[%s1193_s3 + $0x20] sm:$0xff]  ;;  %s1135_s27 = scalar_lea.hbm %s1194_s4, %s640_s1  ;;  %s514_s6 = scalar_lea.sflag [#allocation5], %s997_s16 }
  0x44   : > { %v292_v21 = vmul.f32 %v1013_v4, %v259_v9  ;;  %v294_v24 = vmul.f32 %v1013_v4, %v261_v10  ;;  %v291_v27 = vmul.f32 %v1013_v4, %v258_v13  ;;  %v293_v28 = vmul.f32 %v1013_v4, %v260_v14  ;;  %s765_s7 = scalar_lea.vmem %s1137_s15, 2048  ;;  %p1202_p9 = scmp.ne.s32.totalorder %s1198_s29, 0 }
  0x45   : > { %v304_v15 = vsel %vm271_vm0, %v255_v2, %v288_v6  ;;  %v306_v16 = vsel %vm273_vm1, %v257_v3, %v290_v7  ;;  %v303_v19 = vsel %vm270_vm2, %v254_v5, %v287_v11  ;;  %v305_v20 = vsel %vm272_vm3, %v256_v8, %v289_v12  ;;  %v253_v2 = vld [vmem:[%s1193_s3 + $0x38] sm:$0xff]  ;;  %v238_v3 = vld [vmem:[%s1192_s2] sm:$0xff]  ;;  %v252_v5 = vld [vmem:[%s1193_s3 + $0x30] sm:$0xff]  ;;  %p766_p8 = scmp.ne.s32.totalorder %s1137_s15, %s765_s7  ;;  %s854_s8 = smov [#allocation6]  }
  0x46   : > { %v641_v18 = vpack.c.bf16 %v306_v16, %v304_v15  ;;  %v643_v23 = vpack.c.bf16 %v305_v20, %v303_v19  ;;  %v308_v26 = vsel %vm275_vm4, %v259_v9, %v292_v21  ;;  %v310_v30 = vsel %vm277_vm5, %v261_v10, %v294_v24  ;;  %336 = vperm.xlu1 %734, %v249_v48   ;;  %v239_v6 = vld [vmem:[%s1192_s2 + $0x8] sm:$0xff]  ;;  %v240_v8 = vld [vmem:[%s1192_s2 + $0x10] sm:$0xff]  ;;  %v241_v10 = vld [vmem:[%s1192_s2 + $0x18] sm:$0xff]  ;;  %s769_s9 = sshll.u32 %s854_s8, 4  ;;  %s770_s9 = int_to_ptr.vmem [resolvable:$false] %s769_s9 }
  0x47   : > { %v296_v31 = vmul.f32 %v1013_v4, %v263_v17  ;;  %v298_v32 = vmul.f32 %v1013_v4, %v265_v22  ;;  %v645_v35 = vpack.c.bf16 %v310_v30, %v308_v26  ;;  %v307_v36 = vsel %vm274_vm6, %v258_v13, %v291_v27  ;;  %326 = vperm.xlu0 %733, %v247_v51   ;;  %v243_v7 = vld [vmem:[%s1192_s2 + $0x28] sm:$0xff]  ;;  %v244_v9 = vld [vmem:[%s1192_s2 + $0x30] sm:$0xff]  ;;  %v245_v11 = vld [vmem:[%s1192_s2 + $0x38] sm:$0xff]  ;;  %p767_p11 = pnand %p766_p8, %p1202_p9  ;;  %s771_s10 = scalar_lea.vmem %s770_s9, 4096 }
  0x48   : > { %642 = vmatprep.subr.bf16.mxu0 %v641_v18  ;;  %657 = vmatprep.subr.bf16.mxu1 %v641_v18  ;;  %v309_v37 = vsel %vm276_vm7, %v260_v14, %v293_v28  ;;  %v295_v46 = vmul.f32 %v1013_v4, %v262_v25  ;;  %v297_v47 = vmul.f32 %v1013_v4, %v264_v29  ;;  %vm284_vm15 = vcmp.gt.f32.partialorder %v268_v44, 0.0  ;;  %p772_p6 = scmp.lt.s32.totalorder %s1137_s15, %s770_s9  ;;  %p773_p13 = scmp.lt.s32.totalorder %s771_s10, %s765_s7 }
  0x49   : > { %644 = vmatpush1.bf16.msra.mxu0 %v643_v23  ;;  %661 = vmatpush1.bf16.msra.mxu1 %v643_v23  ;;  %v647_v41 = vpack.c.bf16 %v309_v37, %v307_v36  ;;  %v312_v42 = vsel %vm279_vm8, %v263_v17, %v296_v31  ;;  %v314_v43 = vsel %vm281_vm9, %v265_v22, %v298_v32  ;;  %vm359_vm0 = vcmask 523264   ;;  %p768_p0 = pneg %p767_p11 }
  0x4a   : > { %646 = vmatprep.subr.bf16.mxu0 %v645_v35  ;;  %658 = vmatprep.subr.bf16.mxu1 %v645_v35  ;;  %v649_v45 = vpack.c.bf16 %v314_v43, %v312_v42  ;;  %v300_v49 = vmul.f32 %v1013_v4, %v267_v33  ;;  %v302_v50 = vmul.f32 %v1013_v4, %v269_v34  ;;  %p774_p2 = por %p773_p13, %p772_p6 }
  0x4b   : > { %v311_v52 = vsel %vm278_vm10, %v262_v25, %v295_v46  ;;  %v313_v53 = vsel %vm280_vm11, %v264_v29, %v297_v47  ;;  %v299_v54 = vmul.f32 %v1013_v4, %v266_v38  ;;  %v301_v58 = vmul.f32 %v1013_v4, %v268_v44  ;;  %346 = vperm.xlu1 %734, %v251_v61   ;;  %v242_v4 = vld [vmem:[%s1192_s2 + $0x20] sm:$0xff] }
  0x4c   : > { %v651_v55 = vpack.c.bf16 %v313_v53, %v311_v52  ;;  %v316_v56 = vsel %vm283_vm12, %v267_v33, %v300_v49  ;;  %v318_v57 = vsel %vm285_vm13, %v269_v34, %v302_v50  ;;  %341 = vperm.xlu0 %733, %v250_v63   ;;  %p775_p5 = pnand %p774_p2, %p768_p0 }
  0x4d   : > { %648 = vmatpush1.bf16.msra.mxu0 %v647_v41  ;;  %662 = vmatpush1.bf16.msra.mxu1 %v647_v41  ;;  %v653_v59 = vpack.c.bf16 %v318_v57, %v316_v56  ;;  %v315_v60 = vsel %vm282_vm14, %v266_v38, %v299_v54  ;;  %v317_v62 = vsel %vm284_vm15, %v268_v44, %v301_v58 }
  0x4e   : > { %650 = vmatprep.subr.bf16.mxu0 %v649_v45  ;;  %659 = vmatprep.subr.bf16.mxu1 %v649_v45  ;;  %v655_v1 = vpack.c.bf16 %v317_v62, %v315_v60 }
  0x4f   : > { %356 = vperm.xlu1 %734, %v253_v2  }
  0x50   : > { %351 = vperm.xlu0 %733, %v252_v5  }
  0x51   : > { %652 = vmatpush1.bf16.msra.mxu0 %v651_v55  ;;  %663 = vmatpush1.bf16.msra.mxu1 %v651_v55 }
  0x52   : > { %654 = vmatprep.subr.bf16.mxu0 %v653_v59  ;;  %660 = vmatprep.subr.bf16.mxu1 %v653_v59 }
  0x55   : > { %656 = vmatpush1.bf16.msra.mxu0 %v655_v1  ;;  %664 = vmatpush1.bf16.msra.mxu1 %v655_v1 }
  0x58   : > { %626 = vmatmul.mubr.msk.f32.vlgmr.msra.gmra.mrb[0].mxu0 %vm359_vm0, %v238_v3  ;;  %630 = vmatmul.mubr.msk.f32.vlgmr.msra.gmra.mrb[0].mxu1 %vm359_vm0, %v242_v4 }
  0x59   : > { %454 = vmatprep.mubr.f32.mxu0 %v852_v0  ;;  %478 = vmatprep.mubr.f32.mxu1 %v852_v0 }
  0x5c   : > { %627 = vmatmul.mubr.msk.f32.gmra.mrb[2].mxu0 %vm359_vm0, %v239_v6  ;;  %631 = vmatmul.mubr.msk.f32.gmra.mrb[2].mxu1 %vm359_vm0, %v243_v7 }
  0x5d   : > { %460 = vmatprep.mubr.f32.mxu0 %v852_v0  ;;  %484 = vmatprep.mubr.f32.mxu1 %v852_v0 }
  0x60   : > { %628 = vmatmul.mubr.msk.f32.gmra.mrb[4].mxu0 %vm359_vm0, %v240_v8  ;;  %632 = vmatmul.mubr.msk.f32.gmra.mrb[4].mxu1 %vm359_vm0, %v244_v9 }
  0x61   : > { %466 = vmatprep.mubr.f32.mxu0 %v852_v0  ;;  %490 = vmatprep.mubr.f32.mxu1 %v852_v0 }
  0x64   : > { %629 = vmatmul.mubr.msk.f32.gmra.mrb[6].mxu0 %vm359_vm0, %v241_v10  ;;  %633 = vmatmul.mubr.msk.f32.gmra.mrb[6].mxu1 %vm359_vm0, %v245_v11 }
  0xc1   : > { %v332_v13 = vpop.permute.xlu1 %331 }
  0xc2   : > { %v322_v12 = vpop.permute.xlu0 %321 }
  0xc5   : > { %v337_v15 = vpop.permute.xlu1 %336 }
  0xc6   : > { %v327_v14 = vpop.permute.xlu0 %326 }
  0xca   : > { %v347_v24 = vpop.permute.xlu1 %346 }
  0xcb   : > { %v342_v16 = vpop.permute.xlu0 %341 }
  0xce   : > { %v357_v42 = vpop.permute.xlu1 %356 }
  0xcf   : > { %v352_v33 = vpop.permute.xlu0 %351 }
 0x12b   : > { %v450_v17 = vpop.f32.mrb[0].mxu0  ;;  %v474_v0 = vpop.f32.mrb[0].mxu1 }
 0x12c   : > { %v451_v18 = vadd.f32 %v450_v17, %v322_v12  ;;  %v475_v19 = vadd.f32 %v474_v0, %v342_v16  ;;  %v452_v20 = vpop.f32.mrb[1].mxu0  ;;  %v476_v21 = vpop.f32.mrb[1].mxu1 }
 0x12d   : > { %v453_v22 = vadd.f32 %v452_v20, %v322_v12  ;;  %v477_v23 = vadd.f32 %v476_v21, %v342_v16 }
 0x12e   : > { %497 = vst [vmem:[%s1116_s14] sm:$0xff] %v451_v18  ;;  %505 = vst [vmem:[%s1116_s14 + $0x40] sm:$0xff] %v475_v19 }
 0x12f   : > { %498 = vst [vmem:[%s1116_s14 + $0x8] sm:$0xff] %v453_v22  ;;  %506 = vst [vmem:[%s1116_s14 + $0x48] sm:$0xff] %v477_v23  ;;  %v456_v25 = vpop.f32.mrb[2].mxu0  ;;  %v480_v26 = vpop.f32.mrb[2].mxu1 }
 0x130   : > { %v457_v27 = vadd.f32 %v456_v25, %v327_v14  ;;  %v481_v28 = vadd.f32 %v480_v26, %v347_v24  ;;  %v458_v29 = vpop.f32.mrb[3].mxu0  ;;  %v482_v30 = vpop.f32.mrb[3].mxu1 }
 0x131   : > { %v459_v31 = vadd.f32 %v458_v29, %v327_v14  ;;  %v483_v32 = vadd.f32 %v482_v30, %v347_v24 }
 0x132   : > { %499 = vst [vmem:[%s1116_s14 + $0x10] sm:$0xff] %v457_v27  ;;  %507 = vst [vmem:[%s1116_s14 + $0x50] sm:$0xff] %v481_v28 }
 0x133   : > { %500 = vst [vmem:[%s1116_s14 + $0x18] sm:$0xff] %v459_v31  ;;  %508 = vst [vmem:[%s1116_s14 + $0x58] sm:$0xff] %v483_v32  ;;  %v462_v34 = vpop.f32.mrb[4].mxu0  ;;  %v486_v35 = vpop.f32.mrb[4].mxu1 }
 0x134   : > { %v463_v36 = vadd.f32 %v462_v34, %v332_v13  ;;  %v487_v37 = vadd.f32 %v486_v35, %v352_v33  ;;  %v464_v38 = vpop.f32.mrb[5].mxu0  ;;  %v488_v39 = vpop.f32.mrb[5].mxu1 }
 0x135   : > { %v465_v40 = vadd.f32 %v464_v38, %v332_v13  ;;  %v489_v41 = vadd.f32 %v488_v39, %v352_v33 }
 0x136   : > { %501 = vst [vmem:[%s1116_s14 + $0x20] sm:$0xff] %v463_v36  ;;  %509 = vst [vmem:[%s1116_s14 + $0x60] sm:$0xff] %v487_v37 }
 0x137   : > { %502 = vst [vmem:[%s1116_s14 + $0x28] sm:$0xff] %v465_v40  ;;  %510 = vst [vmem:[%s1116_s14 + $0x68] sm:$0xff] %v489_v41  ;;  %v468_v43 = vpop.f32.mrb[6].mxu0  ;;  %v492_v44 = vpop.f32.mrb[6].mxu1 }
 0x138   : > { %v469_v45 = vadd.f32 %v468_v43, %v337_v15  ;;  %v493_v46 = vadd.f32 %v492_v44, %v357_v42  ;;  %v470_v47 = vpop.f32.mrb[7].mxu0  ;;  %v494_v48 = vpop.f32.mrb[7].mxu1 }
 0x139   : > { %v471_v49 = vadd.f32 %v470_v47, %v337_v15  ;;  %v495_v50 = vadd.f32 %v494_v48, %v357_v42 }
 0x13a   : > { %503 = vst [vmem:[%s1116_s14 + $0x30] sm:$0xff] %v469_v45  ;;  %511 = vst [vmem:[%s1116_s14 + $0x70] sm:$0xff] %v493_v46 }
 0x13b   : > { %504 = vst [vmem:[%s1116_s14 + $0x38] sm:$0xff] %v471_v49  ;;  %512 = vst [vmem:[%s1116_s14 + $0x78] sm:$0xff] %v495_v50 }
 0x13c   : > { %778 = shalt.err (!%p775_p5)
}
 0x13d   : > { %s779_s12 = scalar_lea.hbm %s1135_s27, 2048  ;;  %s783_s11 = scalar_lea.hbm %s1194_s4, 4096 }
 0x13e   : > { %p780_p4 = scmp.ne.s32.totalorder %s1135_s27, %s779_s12  ;;  %p784_p12 = scmp.lt.u32.totalorder %s1135_s27, %s1194_s4 }
 0x13f   : > { %p785_p1 = scmp.lt.u32.totalorder %s783_s11, %s779_s12  ;;  %p787_p8 = scmp.lt.u32.totalorder %s779_s12, %s1135_s27 }
 0x140   : > { %p781_p7 = pnand %p780_p4, %p1202_p9 }
 0x141   : > { %p786_p3 = por %p785_p1, %p784_p12 }
 0x142   : > { %p782_p10 = pneg %p781_p7 }
 0x143   : > { %p788_p11 = por %p787_p8, %p786_p3 }
 0x145   : > { %p789_p0 = pnand %p788_p11, %p782_p10 }
 0x147   : > { %792 = shalt.err (!%p789_p0)
}
 0x148   : > { %s855_s14 = smov 256   ;;  %s856_s1 = smov 16  }
 0x149   : > { %667 = dma.vmem_to_hbm [thread:$0]  (%p1202_p9), %s1137_s15, 2048, %s1135_s27, %s514_s6, %s855_s14, %s855_s14, %s856_s1  }
 0x14a PF: > { %s544_s26 = sand.u32 1, %s827_s17   ;;  %p1203_p6 = scmp.ne.s32.totalorder %s1199_s5, 0 }
 0x14b   : > { %p1204_p13 = scmp.ge.s32.totalorder %s847_s22, 2  ;;  %s545_s20 = scalar_lea.sflag [#allocation5], %s544_s26 }
 0x14d   : > { %p674_p2 = pnand %p1204_p13, %p1203_p6 }
 0x14f   : > { %822 = dma.done.wait (!%p674_p2), %s545_s20, 2048  }
 0x150   : > { %824 = vsyncadd (!%p674_p2), %s545_s20, 4294965248  ;;  %s21_s22 = sadd.s32 1, %s847_s22   ;;  %s1205_s17 = smov %s831_s18 }
 0x151   : > { %p18_p5 = scmp.ge.s32.totalorder %s21_s22, 4   ;;  %s1206_s18 = smov %s835_s19 }
 0x152   : > { %s1207_s19 = smov %s941_s30  ;;  %s1208_s20 = smov %s843_s21 }
 0x153   : > { %s1209_s21 = smov %s1211_s24  ;;  %20 = sbr.rel (!%p18_p5) target bundleno = 8 (0x8), region = 81 }
 0x15a   :  { %550 = vsyncpa [#allocation4], 1 }
 0x15b   :  { %552 = vsyncpa [#allocation4 + $0x1], 1 }
 0x15c   :  { %553 = vsyncpa [#allocation5], 1 }
 0x15d   :  { %555 = vsyncpa [#allocation5 + $0x1], 1 }

</bundles_post_ra>
